<compile_context>
chip_gen: v6e
topology: v6e:2x2x1
jax: 0.10.0
libtpu: 0.0.40
codegen_flags: <defaults>
</compile_context>

<pallas_src>
import functools

import jax
import jax.numpy as jnp
import numpy as np
from jax.experimental import pallas as pl
from jax.experimental.pallas import tpu as pltpu

N_EMBD = 32


def _head_kernel(x_ref, wqkv_ref, o_ref, *, head_size):
    # x_ref: (B, T, C); wqkv_ref: (C, 3*hs) with the 1/sqrt(hs) attention scale
    # already folded into the query columns; o_ref: (B, T, hs).
    B, T, C = x_ref.shape

    # Single fused Q/K/V projection for all batch rows at once (one MXU op
    # on a (B*T, C) x (C, 3*hs) problem instead of 3*B tiny matmuls).
    x2 = x_ref[...].reshape(B * T, C)                              # (B*T, C)
    qkv = jnp.dot(x2, wqkv_ref[...],
                  preferred_element_type=jnp.float32)              # (B*T, 3*hs)
    qkv = qkv.reshape(B, T, 3 * head_size)                         # (B, T, 3*hs)

    q = qkv[:, :, 0 * head_size:1 * head_size]   # already scaled by hs^-0.5
    k = qkv[:, :, 1 * head_size:2 * head_size]
    v = qkv[:, :, 2 * head_size:3 * head_size]

    # Batched attention scores over B, contracting the head dim directly
    # (no materialized k.T, no per-batch Python loop).
    wei = jnp.einsum('btd,bsd->bts', q, k,
                     preferred_element_type=jnp.float32)           # (B, T, T)

    # Numerically-stable softmax over the key axis.
    wei = wei - jnp.max(wei, axis=-1, keepdims=True)
    p = jnp.exp(wei)
    p = p / jnp.sum(p, axis=-1, keepdims=True)

    o_ref[...] = jnp.einsum('bts,bsd->btd', p, v,
                            preferred_element_type=jnp.float32)    # (B, T, hs)


def head_attention(x, w_qkv, *, head_size):
    """x: (B, T, C) f32; w_qkv: (C, 3*head_size) f32 (query cols pre-scaled).

    Returns (B, T, head_size) f32, matching Head.forward semantics.
    """
    B, T, C = x.shape
    kernel = functools.partial(_head_kernel, head_size=head_size)
    return pl.pallas_call(
        kernel,
        out_shape=jax.ShapeDtypeStruct((B, T, head_size), jnp.float32),
        grid_spec=pltpu.PrefetchScalarGridSpec(
            num_scalar_prefetch=0,
            grid=(1,),  # collapsed grid: whole problem fits in VMEM in one step
            in_specs=[
                pl.BlockSpec((B, T, C), lambda i: (0, 0, 0)),
                pl.BlockSpec((C, 3 * head_size), lambda i: (0, 0)),
            ],
            out_specs=pl.BlockSpec((B, T, head_size), lambda i: (0, 0, 0)),
        ),
        compiler_params=pltpu.CompilerParams(
            dimension_semantics=("arbitrary",)),
    )(x, w_qkv)


def reference_head(x, wq, wk, wv, *, head_size):
    """Pure-JAX reference matching the PyTorch Head module semantics."""
    k = x @ wk
    q = x @ wq
    wei = (q @ jnp.swapaxes(k, -2, -1)) * (head_size ** -0.5)
    wei = jax.nn.softmax(wei, axis=-1)
    v = x @ wv
    return wei @ v


if __name__ == "__main__":
    B, T, C = 2, 8, N_EMBD
    head_size = 8

    key = jax.random.PRNGKey(0)
    kx, kq, kk, kv = jax.random.split(key, 4)

    x = jax.random.normal(kx, (B, T, C), dtype=jnp.float32)

    # Deterministic "Linear(no bias)" weights. PyTorch stores (out, in) and
    # computes x @ W.T; we directly build the (in, out) = (C, head_size) forms.
    scale = 1.0 / np.sqrt(C)
    wq = jax.random.uniform(kq, (C, head_size), jnp.float32, -scale, scale)
    wk = jax.random.uniform(kk, (C, head_size), jnp.float32, -scale, scale)
    wv = jax.random.uniform(kv, (C, head_size), jnp.float32, -scale, scale)

    # Host-side weight prep: fuse Q/K/V into one (C, 3*hs) matrix and fold the
    # 1/sqrt(head_size) attention scale into the query columns.
    w_qkv = jnp.concatenate([wq * (head_size ** -0.5), wk, wv], axis=1)

    out = head_attention(x, w_qkv, head_size=head_size)
    out = jax.block_until_ready(out)

    ref = reference_head(x, wq, wk, wv, head_size=head_size)
    np.testing.assert_allclose(np.asarray(out), np.asarray(ref),
                               rtol=1e-5, atol=1e-5)

    print("KERNEL_OK")
</pallas_src>

<mosaic_0001>
module attributes {stable_mosaic.version = 11 : i64} {
  func.func @_head_kernel(%arg0: i32, %arg1: memref<2x8x32xf32, #tpu.memory_space<vmem>>, %arg2: memref<32x24xf32, #tpu.memory_space<vmem>>, %arg3: memref<2x8x8xf32, #tpu.memory_space<vmem>>) attributes {dimension_semantics = [#tpu.dimension_semantics<arbitrary>], iteration_bounds = array<i64: 1>, scalar_prefetch = 0 : i64, scratch_operands = 0 : i64, tpu.core_type = #tpu.core_type<tc>, window_params = [{pipeline_mode = #tpu.pipeline_mode<synchronous>, transform_indices = @transform_0, window_bounds = array<i64: 2, 8, 32>}, {pipeline_mode = #tpu.pipeline_mode<synchronous>, transform_indices = @transform_1, window_bounds = array<i64: 32, 24>}, {pipeline_mode = #tpu.pipeline_mode<synchronous>, transform_indices = @transform_2, window_bounds = array<i64: 2, 8, 8>}]} {
    %c0 = arith.constant 0 : index
    %c0_0 = arith.constant 0 : index
    %c0_1 = arith.constant 0 : index
    %0 = vector.load %arg1[%c0, %c0_0, %c0_1] : memref<2x8x32xf32, #tpu.memory_space<vmem>>, vector<2x8x32xf32>
    %1 = vector.shape_cast %0 : vector<2x8x32xf32> to vector<16x32xf32>
    %c0_2 = arith.constant 0 : index
    %c0_3 = arith.constant 0 : index
    %2 = vector.load %arg2[%c0_2, %c0_3] : memref<32x24xf32, #tpu.memory_space<vmem>>, vector<32x24xf32>
    %cst = arith.constant dense<0.000000e+00> : vector<16x24xf32>
    %3 = tpu.matmul %1, %2, %cst {dimension_numbers = #tpu.dot_dimension_numbers<[1], [0], [0], [1], [0, 0, 1, 1], [], []>} : vector<16x32xf32>, vector<32x24xf32>, vector<16x24xf32> -> vector<16x24xf32>
    %4 = vector.shape_cast %3 : vector<16x24xf32> to vector<2x8x24xf32>
    %5 = vector.extract_strided_slice %4 {offsets = [0, 0, 0], sizes = [2, 8, 8], strides = [1, 1, 1]} : vector<2x8x24xf32> to vector<2x8x8xf32>
    %6 = vector.extract_strided_slice %4 {offsets = [0, 0, 8], sizes = [2, 8, 8], strides = [1, 1, 1]} : vector<2x8x24xf32> to vector<2x8x8xf32>
    %7 = vector.extract_strided_slice %4 {offsets = [0, 0, 16], sizes = [2, 8, 8], strides = [1, 1, 1]} : vector<2x8x24xf32> to vector<2x8x8xf32>
    "tpu.trace_start"() <{level = 10 : i32, message = "btd,bsd->bts"}> : () -> ()
    %cst_4 = arith.constant dense<0.000000e+00> : vector<2x8x8xf32>
    %8 = tpu.matmul %5, %6, %cst_4 {dimension_numbers = #tpu.dot_dimension_numbers<[2], [2], [1], [1], [0, 0, 0, 1, 1, 1], [0], [0]>} : vector<2x8x8xf32>, vector<2x8x8xf32>, vector<2x8x8xf32> -> vector<2x8x8xf32>
    "tpu.trace_stop"() : () -> ()
    %cst_5 = arith.constant dense<0xFF800000> : vector<2x8xf32>
    %9 = vector.multi_reduction <maximumf>, %8, %cst_5 [2] : vector<2x8x8xf32> to vector<2x8xf32>
    %10 = vector.shape_cast %9 : vector<2x8xf32> to vector<2x8x1xf32>
    %11 = vector.broadcast %10 : vector<2x8x1xf32> to vector<2x8x8xf32>
    %12 = arith.subf %8, %11 : vector<2x8x8xf32>
    %13 = math.exp %12 : vector<2x8x8xf32>
    %cst_6 = arith.constant dense<0.000000e+00> : vector<2x8xf32>
    %14 = vector.multi_reduction <add>, %13, %cst_6 [2] : vector<2x8x8xf32> to vector<2x8xf32>
    %15 = vector.shape_cast %14 : vector<2x8xf32> to vector<2x8x1xf32>
    %16 = vector.broadcast %15 : vector<2x8x1xf32> to vector<2x8x8xf32>
    %17 = arith.divf %13, %16 : vector<2x8x8xf32>
    "tpu.trace_start"() <{level = 10 : i32, message = "bts,bsd->btd"}> : () -> ()
    %cst_7 = arith.constant dense<0.000000e+00> : vector<2x8x8xf32>
    %18 = tpu.matmul %17, %7, %cst_7 {dimension_numbers = #tpu.dot_dimension_numbers<[2], [1], [1], [2], [0, 0, 0, 1, 1, 2], [0], [0]>} : vector<2x8x8xf32>, vector<2x8x8xf32>, vector<2x8x8xf32> -> vector<2x8x8xf32>
    "tpu.trace_stop"() : () -> ()
    %c0_8 = arith.constant 0 : index
    %c0_9 = arith.constant 0 : index
    %c0_10 = arith.constant 0 : index
    %19 = vector.load %arg3[%c0_8, %c0_9, %c0_10] : memref<2x8x8xf32, #tpu.memory_space<vmem>>, vector<2x8x8xf32>
    tpu.vector_store %arg3[%c0_8, %c0_9, %c0_10], %18 {strides = array<i32>} : memref<2x8x8xf32, #tpu.memory_space<vmem>>, vector<2x8x8xf32>,
    return
  }
  func.func @transform_0(%arg0: i32) -> (i32, i32, i32) {
    %c0_i32 = arith.constant 0 : i32
    %c0_i32_0 = arith.constant 0 : i32
    %c0_i32_1 = arith.constant 0 : i32
    %c0_i32_2 = arith.constant 0 : i32
    return %c0_i32, %c0_i32_0, %c0_i32_1 : i32, i32, i32
  }
  func.func @transform_1(%arg0: i32) -> (i32, i32) {
    %c0_i32 = arith.constant 0 : i32
    %c0_i32_0 = arith.constant 0 : i32
    %c0_i32_1 = arith.constant 0 : i32
    return %c0_i32, %c0_i32_0 : i32, i32
  }
  func.func @transform_2(%arg0: i32) -> (i32, i32, i32) {
    %c0_i32 = arith.constant 0 : i32
    %c0_i32_0 = arith.constant 0 : i32
    %c0_i32_1 = arith.constant 0 : i32
    %c0_i32_2 = arith.constant 0 : i32
    return %c0_i32, %c0_i32_0, %c0_i32_1 : i32, i32, i32
  }
}

</mosaic_0001>

<bundles_post_ra>
// kernel: tpu_custom_call.1
= control target key start
LH: loop header
LB: loop body
LE: loop exit
PB: predicated region body
PF: predicated region fallthrough
CT: control target
= control target key end

     0   :  { %vm18_vm0 = vcmask 261120   ;;  %s596_s0 = inlined_call_operand.vmem [shape: f32[2,8,32], index: 0, kind: input, shape index: {}]   ;;  %s597_s1 = inlined_call_operand.vmem [shape: f32[32,24], index: 1, kind: input, shape index: {}]   ;;  %s598_s2 = inlined_call_operand.hbm [shape: f32[2,8,8], index: 2, kind: output, shape index: {}]  }
   0x1   :  { %v17_v0 = vld [vmem:[%s597_s1 + $0x18] sm:$0xff]  ;;  %v16_v1 = vld [vmem:[%s597_s1 + $0x10] sm:$0xff]  ;;  %v12_v2 = vld [vmem:[%s596_s0] sm:$0xff] }
   0x2   :  { %469 = vmatprep.subr.mxu0 %v17_v0  ;;  %v15_v3 = vld [vmem:[%s597_s1 + $0x8] sm:$0xff]  ;;  %477 = vmatprep.mubr.msk.f32.mxu0 %vm18_vm0, %v12_v2 }
   0x3   :  { %470 = vmatpush3.msra.mxu0 %v17_v0 }
   0x4   :  { %7 = vsyncpa [#allocation3], 0  ;;  %471 = vmatprep.subr.mxu0 %v16_v1  ;;  %v14_v4 = vld [vmem:[%s597_s1] sm:$0xff]  ;;  %v13_v5 = vld [vmem:[%s596_s0 + $0x8] sm:$0xff]  ;;  %v537_v6 = vmov 0.0   ;;  %vm538_vm1 = vmmov 0  }
   0x5   :  { %472 = vmatpush3.msra.mxu0 %v16_v1  ;;  %480 = vmatprep.subr.mxu1 %v537_v6  ;;  %s539_s1 = smov 120   ;;  %vm103_vm2 = vcmask 64512   ;;  %s540_s0 = smov 112  }
   0x6   :  { %473 = vmatprep.subr.mxu0 %v15_v3  ;;  %482 = vmatprep.mubr.msk.f32.mxu1 %vm538_vm1, %v537_v6  ;;  %s541_s21 = smov [#allocation2]  }
   0x7   :  { %474 = vmatpush3.msra.mxu0 %v15_v3  ;;  %s436_s22 = sshll.u32 %s541_s21, 4  ;;  %s437_s22 = int_to_ptr.vmem [resolvable:$true] %s436_s22 }
   0x8   :  { %475 = vmatprep.subr.mxu0 %v14_v4  ;;  %s515_s23 = scalar_lea.vmem %s437_s22, 256  ;;  %p520_p1 = scmp.lt.s32.totalorder %s437_s22, %s437_s22 }
   0x9   :  { %476 = vmatpush3.msra.mxu0 %v14_v4  ;;  %p516_p0 = scmp.ne.s32.totalorder %s437_s22, %s515_s23  ;;  %p521_p2 = scmp.lt.s32.totalorder %s515_s23, %s515_s23 }
   0xa   :  { %478 = vmatmul.mubr.msk.f32.vlgmr.msra.gmra.mxu0 %vm18_vm0, %v13_v5  ;;  %490 = vmatprep.subr.mxu0 %v537_v6 }
   0xb   :  { %492 = vmatprep.mubr.msk.f32.mxu0 %vm538_vm1, %v537_v6  ;;  %p522_p3 = por %p521_p2, %p520_p1 }
   0xd   :  { %p523_p4 = pnand %p522_p3, %p516_p0 }
  0xca   :  { %v479_v7 = vpop.f32.mrf.mxu0 }
  0xcc   :  { %v91_v8 = vpop.f32.mrf.mxu0 }
  0xcd   :  { %101 = vrot.lane.b32.xlu0 %v91_v8, %s539_s1 }
  0xd1   :  { %179 = vrot.lane.b32.xlu0 %v479_v7, %s539_s1 }
 0x13f   :  { %v102_v9 = vpop.permute.xlu0 %101 }
 0x140   :  { %481 = vmatpush3.xpose.msk.msra.mxu1 %vm103_vm2, %v102_v9 }
 0x141   :  { %485 = vmatprep.subr.mxu1 %v537_v6 }
 0x143   :  { %483 = vmatmul.mubr.msk.f32.vlgmr.msra.gmra.mxu1 %vm103_vm2, %v91_v8  ;;  %v180_v10 = vpop.permute.xlu0 %179 }
 0x144   :  { %486 = vmatpush3.xpose.msk.msra.mxu1 %vm103_vm2, %v180_v10  ;;  %487 = vmatprep.mubr.msk.f32.mxu1 %vm538_vm1, %v537_v6 }
 0x145   :  { %495 = vmatprep.subr.mxu1 %v537_v6 }
 0x147   :  { %488 = vmatmul.mubr.msk.f32.vlgmr.msra.gmra.mxu1 %vm103_vm2, %v479_v7 }
 0x148   :  { %497 = vmatprep.mubr.msk.f32.mxu1 %vm538_vm1, %v537_v6 }
 0x203   :  { %v174_v11 = vpop.f32.mrf.mxu1 }
 0x204   :  { %v255_v12 = vsel %vm103_vm2, %v174_v11, -inf }
 0x205   :  { %256 = vmax.xlane.f32.xlu1 %v255_v12  ;;  %v484_v13 = vpop.f32.mrf.mxu1 }
 0x207   :  { %v251_v14 = vpop.f32.mrf.mxu1 }
 0x208   :  { %v258_v15 = vsel %vm103_vm2, %v251_v14, -inf }
 0x209   :  { %259 = vmax.xlane.f32.xlu1 %v258_v15  ;;  %v489_v16 = vpop.f32.mrf.mxu1 }
 0x21a   :  { %277 = vrot.lane.b32.xlu1 %v91_v8, %s540_s0 }
 0x28e   :  { %v257_v17 = vpop.xlane.xlu1 %256 }
 0x28f   :  { %v261_v18 = vsub.f32 %v174_v11, %v257_v17 }
 0x291   :  { %v263_v19 = vmul.f32 1.442695, %v261_v18 }
 0x292   :  { %v260_v20 = vpop.xlane.xlu1 %259 }
 0x293   :  { %507 = vpow2.f32 %v263_v19  ;;  %v262_v21 = vsub.f32 %v251_v14, %v260_v20 }
 0x295   :  { %v265_v22 = vmul.f32 1.442695, %v262_v21 }
 0x296   :  { %v278_v23 = vpop.permute.xlu1 %277 }
 0x297   :  { %509 = vpow2.f32 %v265_v22  ;;  %491 = vmatpush3.msra.mxu0 %v278_v23 }
 0x2a0   :  { %v508_v24 = vpop.eup %507 }
 0x2a1   :  { %v267_v25 = vsel %vm103_vm2, %v508_v24, 0.0 }
 0x2a2   :  { %268 = vadd.xlane.f32.xlu0 %v267_v25 }
 0x2a4   :  { %v510_v26 = vpop.eup %509 }
 0x2a5   :  { %v270_v27 = vsel %vm103_vm2, %v510_v26, 0.0 }
 0x2a6   :  { %271 = vadd.xlane.f32.xlu1 %v270_v27 }
 0x2b7   :  { %353 = vrot.lane.b32.xlu1 %v479_v7, %s540_s0 }
 0x32b   :  { %v269_v28 = vpop.xlane.xlu0 %268 }
 0x32c   :  { %511 = vrcp.f32 %v269_v28 }
 0x32f   :  { %v272_v29 = vpop.xlane.xlu1 %271 }
 0x330   :  { %513 = vrcp.f32 %v272_v29 }
 0x333   :  { %v354_v30 = vpop.permute.xlu1 %353 }
 0x334   :  { %496 = vmatpush3.msra.mxu1 %v354_v30 }
 0x339   :  { %v512_v31 = vpop.eup %511 }
 0x33a   :  { %v274_v32 = vmul.f32 %v512_v31, %v508_v24 }
 0x33c   :  { %493 = vmatmul.mubr.msk.f32.vlgmr.msra.gmra.mxu0 %vm103_vm2, %v274_v32 }
 0x33d   :  { %v514_v33 = vpop.eup %513 }
 0x33e   :  { %v276_v34 = vmul.f32 %v514_v33, %v510_v26 }
 0x340   :  { %498 = vmatmul.mubr.msk.f32.vlgmr.msra.gmra.mxu1 %vm103_vm2, %v276_v34 }
 0x3fc   :  { %v349_v35 = vpop.f32.mrf.mxu0 }
 0x3fd   :  { %429 = vst.msk [vmem:[#allocation2] sm:$0xff] %vm103_vm2, %v349_v35 }
 0x3fe   :  { %v494_v36 = vpop.f32.mrf.mxu0 }
 0x400   :  { %v425_v37 = vpop.f32.mrf.mxu1 }
 0x401   :  { %430 = vst.msk [vmem:[#allocation2 + $0x8] sm:$0xff] %vm103_vm2, %v425_v37 }
 0x402   :  { %v499_v38 = vpop.f32.mrf.mxu1 }
 0x403   :  { %526 = shalt.err (!%p523_p4)
}
 0x404   :  { %s542_s24 = smov 128   ;;  %s543_s25 = smov 8  }
 0x405   :  { %442 = dma.vmem_to_hbm [thread:$0]  %s437_s22, 256, %s598_s2, [#allocation3], %s542_s24, %s542_s24, %s543_s25  }
 0x406   :  { %535 = dma.done.wait [#allocation3], 256  }
 0x407   :  { %536 = vsyncadd [#allocation3], 4294967040 }
 0x408   :  { %446 = vsyncpa [#allocation3], 1 }

</bundles_post_ra>
